<compile_context>
chip_gen: v6e
topology: v6e:2x2x1
jax: 0.10.0
libtpu: 0.0.40
codegen_flags: <defaults>
</compile_context>

<pallas_src>
import functools

import jax
import jax.numpy as jnp
from jax.experimental import pallas as pl
from jax.experimental.pallas import tpu as pltpu


def sentiment_lstm_kernel(tok_ref, table_ref, rrec_ref, fcw_ref, fcb_ref, out_ref):
    BT, O = out_ref.shape
    V = table_ref.shape[0]
    H2 = rrec_ref.shape[0]            # 2H (joint [layer1 | layer2] width)
    H = H2 // 2
    T = tok_ref.shape[0] // BT
    f32 = jnp.float32

    # ---- fused embedding gather + layer-1 input projection (one hoisted MXU matmul) ----
    # one_hot(tokens) @ table, where table row v = [emb[v] @ Wih1^T + b1 | b2] in the joint
    # gate-column layout [i1 i2 f1 f2 o1 o2 g1 g2].
    # TODO(synk): for large vocabularies replace the one-hot MXU gather with a
    # scalar-prefetch / manual-DMA row gather.
    tok = tok_ref[...]                                               # (T*BT, 1) int32
    lane = jax.lax.broadcasted_iota(jnp.int32, (T * BT, V), 1)
    one_hot = (lane == tok).astype(f32)                              # exact 0/1 gather matrix
    pre = jnp.dot(one_hot, table_ref[...], preferred_element_type=f32)   # (T*BT, 8H)
    # NOTE: at BT=8 `pre` is only ~16 vregs; for large batch tiles stream it from a VMEM
    # scratch per step instead of keeping it live across the unrolled loop.

    rrec = rrec_ref[...]                                             # (2H, 8H) fused recurrence

    def joint_cell(g, hcat, ccat):
        # sigmoid over the contiguous [i1 i2 f1 f2 o1 o2] columns, tanh over [g1 g2]:
        # one EUP pass each (half the transcendental work of full-tile sigmoid + tanh).
        s = jax.nn.sigmoid(g[:, :3 * H2])
        t = jnp.tanh(g[:, 3 * H2:])
        icat = s[:, 0 * H2:1 * H2]
        fcat = s[:, 1 * H2:2 * H2]
        ocat = s[:, 2 * H2:3 * H2]
        ccat = fcat * ccat + icat * t
        hcat = ocat * jnp.tanh(ccat)
        return hcat, ccat

    hcat = jnp.zeros((BT, H2), f32)   # [h1_{s-1} | h2_{s-2}] (layer 2 skewed one step behind)
    ccat = jnp.zeros((BT, H2), f32)

    # s = 0: layer-1 timestep 0 only (recurrent term is exactly zero -> no matmul); then zero
    # the spurious layer-2 half so h2_{-1} = c2_{-1} = 0.
    hcat, ccat = joint_cell(pre[0:BT], hcat, ccat)
    l1mask = (jax.lax.broadcasted_iota(jnp.int32, (BT, H2), 1) < H).astype(f32)
    hcat = hcat * l1mask
    ccat = ccat * l1mask

    # s = 1..T: ONE fused (BT,2H)x(2H,8H) matmul per step drives layer-1 step s and layer-2
    # step s-1, so the dependent MXU chain is T+1 instead of 2T and no h1seq scratch is needed.
    # Static unroll is fine at T=8; switch to lax.fori_loop(..., unroll=k) for long sequences.
    for s in range(1, T + 1):
        blk = min(s, T - 1)  # s == T: layer-2 columns of any block are just b2 (token-free);
                             # the layer-1 half of that phantom step is computed and discarded.
        g = pre[blk * BT:(blk + 1) * BT] + jnp.dot(hcat, rrec, preferred_element_type=f32)
        hcat, ccat = joint_cell(g, hcat, ccat)

    # hcat[:, H:2H] is h2 at the last timestep.
    # TODO(synk): nn.Dropout(0.3) and the LSTM inter-layer dropout are identity in eval mode.
    if O == 1:
        # fc weight pre-padded to (1, 2H) with zeros over the layer-1 half -> VPU multiply +
        # lane reduction instead of an MXU fill/drain for a single output lane.
        logit = jnp.sum(hcat * fcw_ref[...], axis=-1, keepdims=True) + fcb_ref[...]
    else:
        logit = jnp.dot(hcat, fcw_ref[...], preferred_element_type=f32) + fcb_ref[...]
    out_ref[...] = jax.nn.sigmoid(logit)


@functools.partial(jax.jit, static_argnames=("batch_tile",))
def sentiment_forward(tokens, params, *, batch_tile=8):
    """tokens: int32 (B, T). Returns (B, O) float32 probabilities (eval-mode forward)."""
    B, T = tokens.shape
    f32 = jnp.float32
    emb = params["embedding"].astype(f32)               # (V, E)
    V = emb.shape[0]
    H = params["w_hh_l0"].shape[1]
    O = params["fc_w"].shape[0]
    BT = batch_tile                                     # batch tile (multiple of 8 sublanes)
    Bp = ((B + BT - 1) // BT) * BT
    G = Bp // BT

    # Token layout glue (tiny int ops only; the f32 embedding gather itself is fused in-kernel).
    tok = jnp.pad(tokens.astype(jnp.int32), ((0, Bp - B), (0, 0)))         # (Bp, T)
    tok = tok.reshape(G, BT, T).transpose(0, 2, 1).reshape(G, T * BT, 1)   # time-major per tile

    def gate_blocks(w):   # PyTorch (4H, in) packed [i;f;g;o] -> four (in, H) transposed blocks
        return [w[k * H:(k + 1) * H].T.astype(f32) for k in range(4)]

    def bias_blocks(b):
        return [b[k * H:(k + 1) * H].astype(f32) for k in range(4)]

    b1i, b1f, b1g, b1o = bias_blocks(params["b_ih_l0"] + params["b_hh_l0"])
    b2i, b2f, b2g, b2o = bias_blocks(params["b_ih_l1"] + params["b_hh_l1"])
    i1x, f1x, g1x, o1x = gate_blocks(params["w_ih_l0"])      # (E, H) each
    i1r, f1r, g1r, o1r = gate_blocks(params["w_hh_l0"])      # (H, H)
    i2x, f2x, g2x, o2x = gate_blocks(params["w_ih_l1"])      # (H, H) layer-2 input proj (of h1)
    i2r, f2r, g2r, o2r = gate_blocks(params["w_hh_l1"])      # (H, H)

    # "token -> joint gate bias" table: row v = emb[v] @ Wih1^T + b1 interleaved with b2, in the
    # joint column layout [i1 i2 f1 f2 o1 o2 g1 g2] (sigmoid gates first, tanh gates last).
    ones_v = jnp.ones((V, 1), f32)
    table = jnp.concatenate(
        [emb @ i1x + b1i, ones_v * b2i,
         emb @ f1x + b1f, ones_v * b2f,
         emb @ o1x + b1o, ones_v * b2o,
         emb @ g1x + b1g, ones_v * b2g], axis=1)              # (V, 8H)

    # Fused skewed recurrence weight (2H, 8H):
    #   rows [0:H)  (times h1_{s-1}) -> Whh1^T into layer-1 cols, Wih2^T into layer-2 cols
    #   rows [H:2H) (times h2_{s-2}) -> Whh2^T into layer-2 cols, zeros into layer-1 cols
    zhh = jnp.zeros((H, H), f32)
    rrec = jnp.concatenate([
        jnp.concatenate([i1r, i2x, f1r, f2x, o1r, o2x, g1r, g2x], axis=1),
        jnp.concatenate([zhh, i2r, zhh, f2r, zhh, o2r, zhh, g2r], axis=1)], axis=0)

    if O == 1:
        fcw = jnp.concatenate([jnp.zeros((1, H), f32),
                               params["fc_w"].astype(f32).reshape(1, H)], axis=1)   # (1, 2H)
    else:
        fcw = jnp.concatenate([jnp.zeros((H, O), f32),
                               params["fc_w"].astype(f32).T], axis=0)               # (2H, O)
    fcb = params["fc_b"].astype(f32).reshape(1, O)

    out = pl.pallas_call(
        sentiment_lstm_kernel,
        out_shape=jax.ShapeDtypeStruct((Bp, O), f32),
        grid=(G,),                                           # batch-tile grid: pipelines token
        in_specs=[                                           # DMAs, weights stay resident
            pl.BlockSpec((None, T * BT, 1), lambda g: (g, 0, 0)),
            pl.BlockSpec((V, 8 * H), lambda g: (0, 0)),
            pl.BlockSpec((2 * H, 8 * H), lambda g: (0, 0)),
            pl.BlockSpec(fcw.shape, lambda g: (0, 0)),
            pl.BlockSpec((1, O), lambda g: (0, 0)),
        ],
        out_specs=pl.BlockSpec((BT, O), lambda g: (g, 0)),
        compiler_params=pltpu.CompilerParams(
            dimension_semantics=("parallel",),   # v7x: batch tiles shard across both TensorCores
            vmem_limit_bytes=32 * 1024 * 1024,   # explicit limit, safe on v5e/v6e/v7x
        ),
    )(tok, table, rrec, fcw, fcb)
    return out[:B]


def reference_forward(tokens, params):
    """Pure-JAX reference with PyTorch LSTM semantics (eval mode)."""
    emb = params["embedding"]
    x = jnp.take(emb, tokens, axis=0)               # (B, T, E)
    B, T, _ = x.shape
    H = params["w_hh_l0"].shape[1]

    def run_layer(seq, wih, whh, bih, bhh):
        h = jnp.zeros((B, H), jnp.float32)
        c = jnp.zeros((B, H), jnp.float32)
        outs = []
        for t in range(T):
            g = seq[:, t, :] @ wih.T + bih + h @ whh.T + bhh
            i = jax.nn.sigmoid(g[:, 0 * H:1 * H])
            f = jax.nn.sigmoid(g[:, 1 * H:2 * H])
            gg = jnp.tanh(g[:, 2 * H:3 * H])
            o = jax.nn.sigmoid(g[:, 3 * H:4 * H])
            c = f * c + i * gg
            h = o * jnp.tanh(c)
            outs.append(h)
        return jnp.stack(outs, axis=1)

    o1 = run_layer(x, params["w_ih_l0"], params["w_hh_l0"],
                   params["b_ih_l0"], params["b_hh_l0"])
    o2 = run_layer(o1, params["w_ih_l1"], params["w_hh_l1"],
                   params["b_ih_l1"], params["b_hh_l1"])
    last = o2[:, -1, :]
    return jax.nn.sigmoid(last @ params["fc_w"].T + params["fc_b"])


def init_params(key, vocab, E, H, O):
    ks = jax.random.split(key, 12)
    u = lambda k, shape, s: jax.random.uniform(k, shape, jnp.float32, -s, s)
    s = 1.0 / jnp.sqrt(H)
    return {
        "embedding": u(ks[0], (vocab, E), 0.5),
        "w_ih_l0": u(ks[1], (4 * H, E), s),
        "w_hh_l0": u(ks[2], (4 * H, H), s),
        "b_ih_l0": u(ks[3], (4 * H,), s),
        "b_hh_l0": u(ks[4], (4 * H,), s),
        "w_ih_l1": u(ks[5], (4 * H, H), s),
        "w_hh_l1": u(ks[6], (4 * H, H), s),
        "b_ih_l1": u(ks[7], (4 * H,), s),
        "b_hh_l1": u(ks[8], (4 * H,), s),
        "fc_w": u(ks[9], (O, H), s),
        "fc_b": u(ks[10], (O,), s),
    }


if __name__ == "__main__":
    B, T = 2, 8
    VOCAB, E, H, O = 50, 64, 32, 1

    root = jax.random.PRNGKey(0)
    k_tok, k_par = jax.random.split(root)
    tokens = jax.random.randint(k_tok, (B, T), 0, VOCAB, dtype=jnp.int32)
    params = init_params(k_par, VOCAB, E, H, O)

    out = sentiment_forward(tokens, params)
    out = jax.block_until_ready(out)

    ref = reference_forward(tokens, params)
    assert out.shape == (B, O)
    assert jnp.allclose(out, ref, atol=1e-3, rtol=1e-3), (out, ref)

    print("KERNEL_OK")
</pallas_src>

<mosaic_0001>
module attributes {stable_mosaic.version = 11 : i64} {
  func.func @sentiment_lstm_kernel(%arg0: i32, %arg1: memref<1x64x1xi32, #tpu.memory_space<vmem>>, %arg2: memref<50x256xf32, #tpu.memory_space<vmem>>, %arg3: memref<64x256xf32, #tpu.memory_space<vmem>>, %arg4: memref<1x64xf32, #tpu.memory_space<vmem>>, %arg5: memref<1x1xf32, #tpu.memory_space<vmem>>, %arg6: memref<8x1xf32, #tpu.memory_space<vmem>>) attributes {dimension_semantics = [#tpu.dimension_semantics<parallel>], iteration_bounds = array<i64: 1>, scalar_prefetch = 0 : i64, scratch_operands = 0 : i64, tpu.core_type = #tpu.core_type<tc>, window_params = [{transform_indices = @transform_0, window_bounds = array<i64: 1, 64, 1>}, {pipeline_mode = #tpu.pipeline_mode<synchronous>, transform_indices = @transform_1, window_bounds = array<i64: 50, 256>}, {pipeline_mode = #tpu.pipeline_mode<synchronous>, transform_indices = @transform_2, window_bounds = array<i64: 64, 256>}, {pipeline_mode = #tpu.pipeline_mode<synchronous>, transform_indices = @transform_3, window_bounds = array<i64: 1, 64>}, {pipeline_mode = #tpu.pipeline_mode<synchronous>, transform_indices = @transform_4, window_bounds = array<i64: 1, 1>}, {transform_indices = @transform_5, window_bounds = array<i64: 8, 1>}]} {
    %c0 = arith.constant 0 : index
    %c0_0 = arith.constant 0 : index
    %c0_1 = arith.constant 0 : index
    %0 = vector.load %arg1[%c0, %c0_0, %c0_1] : memref<1x64x1xi32, #tpu.memory_space<vmem>>, vector<1x64x1xi32>
    %1 = vector.shape_cast %0 : vector<1x64x1xi32> to vector<64x1xi32>
    %2 = tpu.iota {dimensions = array<i32: 1>} : vector<64x50xi32>
    %3 = vector.broadcast %1 : vector<64x1xi32> to vector<64x50xi32>
    %4 = arith.cmpi eq, %2, %3 : vector<64x50xi32>
    %5 = arith.extui %4 : vector<64x50xi1> to vector<64x50xi32>
    %6 = arith.sitofp %5 : vector<64x50xi32> to vector<64x50xf32>
    %c0_2 = arith.constant 0 : index
    %c0_3 = arith.constant 0 : index
    %7 = vector.load %arg2[%c0_2, %c0_3] : memref<50x256xf32, #tpu.memory_space<vmem>>, vector<50x256xf32>
    %cst = arith.constant dense<0.000000e+00> : vector<64x256xf32>
    %8 = tpu.matmul %6, %7, %cst {dimension_numbers = #tpu.dot_dimension_numbers<[1], [0], [0], [1], [0, 0, 1, 1], [], []>} : vector<64x50xf32>, vector<50x256xf32>, vector<64x256xf32> -> vector<64x256xf32>
    %c0_4 = arith.constant 0 : index
    %c0_5 = arith.constant 0 : index
    %9 = vector.load %arg3[%c0_4, %c0_5] : memref<64x256xf32, #tpu.memory_space<vmem>>, vector<64x256xf32>
    %cst_6 = arith.constant 0.000000e+00 : f32
    %10 = vector.broadcast %cst_6 : f32 to vector<8x64xf32>
    %11 = vector.extract_strided_slice %8 {offsets = [0, 0], sizes = [8, 256], strides = [1, 1]} : vector<64x256xf32> to vector<8x256xf32>
    %12 = vector.extract_strided_slice %11 {offsets = [0, 0], sizes = [8, 192], strides = [1, 1]} : vector<8x256xf32> to vector<8x192xf32>
    %13 = arith.negf %12 : vector<8x192xf32>
    %14 = math.exp %13 : vector<8x192xf32>
    %cst_7 = arith.constant 1.000000e+00 : f32
    %15 = vector.broadcast %cst_7 : f32 to vector<8x192xf32>
    %16 = arith.addf %15, %14 : vector<8x192xf32>
    %17 = arith.divf %15, %16 : vector<8x192xf32>
    %18 = vector.extract_strided_slice %11 {offsets = [0, 192], sizes = [8, 64], strides = [1, 1]} : vector<8x256xf32> to vector<8x64xf32>
    %19 = math.tanh %18 : vector<8x64xf32>
    %20 = vector.extract_strided_slice %17 {offsets = [0, 0], sizes = [8, 64], strides = [1, 1]} : vector<8x192xf32> to vector<8x64xf32>
    %21 = vector.extract_strided_slice %17 {offsets = [0, 64], sizes = [8, 64], strides = [1, 1]} : vector<8x192xf32> to vector<8x64xf32>
    %22 = vector.extract_strided_slice %17 {offsets = [0, 128], sizes = [8, 64], strides = [1, 1]} : vector<8x192xf32> to vector<8x64xf32>
    %23 = arith.mulf %21, %10 : vector<8x64xf32>
    %24 = arith.mulf %20, %19 : vector<8x64xf32>
    %25 = arith.addf %23, %24 : vector<8x64xf32>
    %26 = math.tanh %25 : vector<8x64xf32>
    %27 = arith.mulf %22, %26 : vector<8x64xf32>
    %28 = tpu.iota {dimensions = array<i32: 1>} : vector<8x64xi32>
    %c32_i32 = arith.constant 32 : i32
    %29 = vector.broadcast %c32_i32 : i32 to vector<8x64xi32>
    %30 = arith.cmpi slt, %28, %29 : vector<8x64xi32>
    %31 = arith.extui %30 : vector<8x64xi1> to vector<8x64xi32>
    %32 = arith.sitofp %31 : vector<8x64xi32> to vector<8x64xf32>
    %33 = arith.mulf %27, %32 : vector<8x64xf32>
    %34 = arith.mulf %25, %32 : vector<8x64xf32>
    %35 = vector.extract_strided_slice %8 {offsets = [8, 0], sizes = [8, 256], strides = [1, 1]} : vector<64x256xf32> to vector<8x256xf32>
    %cst_8 = arith.constant dense<0.000000e+00> : vector<8x256xf32>
    %36 = tpu.matmul %33, %9, %cst_8 {dimension_numbers = #tpu.dot_dimension_numbers<[1], [0], [0], [1], [0, 0, 1, 1], [], []>} : vector<8x64xf32>, vector<64x256xf32>, vector<8x256xf32> -> vector<8x256xf32>
    %37 = arith.addf %35, %36 : vector<8x256xf32>
    %38 = vector.extract_strided_slice %37 {offsets = [0, 0], sizes = [8, 192], strides = [1, 1]} : vector<8x256xf32> to vector<8x192xf32>
    %39 = arith.negf %38 : vector<8x192xf32>
    %40 = math.exp %39 : vector<8x192xf32>
    %cst_9 = arith.constant 1.000000e+00 : f32
    %41 = vector.broadcast %cst_9 : f32 to vector<8x192xf32>
    %42 = arith.addf %41, %40 : vector<8x192xf32>
    %43 = arith.divf %41, %42 : vector<8x192xf32>
    %44 = vector.extract_strided_slice %37 {offsets = [0, 192], sizes = [8, 64], strides = [1, 1]} : vector<8x256xf32> to vector<8x64xf32>
    %45 = math.tanh %44 : vector<8x64xf32>
    %46 = vector.extract_strided_slice %43 {offsets = [0, 0], sizes = [8, 64], strides = [1, 1]} : vector<8x192xf32> to vector<8x64xf32>
    %47 = vector.extract_strided_slice %43 {offsets = [0, 64], sizes = [8, 64], strides = [1, 1]} : vector<8x192xf32> to vector<8x64xf32>
    %48 = vector.extract_strided_slice %43 {offsets = [0, 128], sizes = [8, 64], strides = [1, 1]} : vector<8x192xf32> to vector<8x64xf32>
    %49 = arith.mulf %47, %34 : vector<8x64xf32>
    %50 = arith.mulf %46, %45 : vector<8x64xf32>
    %51 = arith.addf %49, %50 : vector<8x64xf32>
    %52 = math.tanh %51 : vector<8x64xf32>
    %53 = arith.mulf %48, %52 : vector<8x64xf32>
    %54 = vector.extract_strided_slice %8 {offsets = [16, 0], sizes = [8, 256], strides = [1, 1]} : vector<64x256xf32> to vector<8x256xf32>
    %cst_10 = arith.constant dense<0.000000e+00> : vector<8x256xf32>
    %55 = tpu.matmul %53, %9, %cst_10 {dimension_numbers = #tpu.dot_dimension_numbers<[1], [0], [0], [1], [0, 0, 1, 1], [], []>} : vector<8x64xf32>, vector<64x256xf32>, vector<8x256xf32> -> vector<8x256xf32>
    %56 = arith.addf %54, %55 : vector<8x256xf32>
    %57 = vector.extract_strided_slice %56 {offsets = [0, 0], sizes = [8, 192], strides = [1, 1]} : vector<8x256xf32> to vector<8x192xf32>
    %58 = arith.negf %57 : vector<8x192xf32>
    %59 = math.exp %58 : vector<8x192xf32>
    %cst_11 = arith.constant 1.000000e+00 : f32
    %60 = vector.broadcast %cst_11 : f32 to vector<8x192xf32>
    %61 = arith.addf %60, %59 : vector<8x192xf32>
    %62 = arith.divf %60, %61 : vector<8x192xf32>
    %63 = vector.extract_strided_slice %56 {offsets = [0, 192], sizes = [8, 64], strides = [1, 1]} : vector<8x256xf32> to vector<8x64xf32>
    %64 = math.tanh %63 : vector<8x64xf32>
    %65 = vector.extract_strided_slice %62 {offsets = [0, 0], sizes = [8, 64], strides = [1, 1]} : vector<8x192xf32> to vector<8x64xf32>
    %66 = vector.extract_strided_slice %62 {offsets = [0, 64], sizes = [8, 64], strides = [1, 1]} : vector<8x192xf32> to vector<8x64xf32>
    %67 = vector.extract_strided_slice %62 {offsets = [0, 128], sizes = [8, 64], strides = [1, 1]} : vector<8x192xf32> to vector<8x64xf32>
    %68 = arith.mulf %66, %51 : vector<8x64xf32>
    %69 = arith.mulf %65, %64 : vector<8x64xf32>
    %70 = arith.addf %68, %69 : vector<8x64xf32>
    %71 = math.tanh %70 : vector<8x64xf32>
    %72 = arith.mulf %67, %71 : vector<8x64xf32>
    %73 = vector.extract_strided_slice %8 {offsets = [24, 0], sizes = [8, 256], strides = [1, 1]} : vector<64x256xf32> to vector<8x256xf32>
    %cst_12 = arith.constant dense<0.000000e+00> : vector<8x256xf32>
    %74 = tpu.matmul %72, %9, %cst_12 {dimension_numbers = #tpu.dot_dimension_numbers<[1], [0], [0], [1], [0, 0, 1, 1], [], []>} : vector<8x64xf32>, vector<64x256xf32>, vector<8x256xf32> -> vector<8x256xf32>
    %75 = arith.addf %73, %74 : vector<8x256xf32>
    %76 = vector.extract_strided_slice %75 {offsets = [0, 0], sizes = [8, 192], strides = [1, 1]} : vector<8x256xf32> to vector<8x192xf32>
    %77 = arith.negf %76 : vector<8x192xf32>
    %78 = math.exp %77 : vector<8x192xf32>
    %cst_13 = arith.constant 1.000000e+00 : f32
    %79 = vector.broadcast %cst_13 : f32 to vector<8x192xf32>
    %80 = arith.addf %79, %78 : vector<8x192xf32>
    %81 = arith.divf %79, %80 : vector<8x192xf32>
    %82 = vector.extract_strided_slice %75 {offsets = [0, 192], sizes = [8, 64], strides = [1, 1]} : vector<8x256xf32> to vector<8x64xf32>
    %83 = math.tanh %82 : vector<8x64xf32>
    %84 = vector.extract_strided_slice %81 {offsets = [0, 0], sizes = [8, 64], strides = [1, 1]} : vector<8x192xf32> to vector<8x64xf32>
    %85 = vector.extract_strided_slice %81 {offsets = [0, 64], sizes = [8, 64], strides = [1, 1]} : vector<8x192xf32> to vector<8x64xf32>
    %86 = vector.extract_strided_slice %81 {offsets = [0, 128], sizes = [8, 64], strides = [1, 1]} : vector<8x192xf32> to vector<8x64xf32>
    %87 = arith.mulf %85, %70 : vector<8x64xf32>
    %88 = arith.mulf %84, %83 : vector<8x64xf32>
    %89 = arith.addf %87, %88 : vector<8x64xf32>
    %90 = math.tanh %89 : vector<8x64xf32>
    %91 = arith.mulf %86, %90 : vector<8x64xf32>
    %92 = vector.extract_strided_slice %8 {offsets = [32, 0], sizes = [8, 256], strides = [1, 1]} : vector<64x256xf32> to vector<8x256xf32>
    %cst_14 = arith.constant dense<0.000000e+00> : vector<8x256xf32>
    %93 = tpu.matmul %91, %9, %cst_14 {dimension_numbers = #tpu.dot_dimension_numbers<[1], [0], [0], [1], [0, 0, 1, 1], [], []>} : vector<8x64xf32>, vector<64x256xf32>, vector<8x256xf32> -> vector<8x256xf32>
    %94 = arith.addf %92, %93 : vector<8x256xf32>
    %95 = vector.extract_strided_slice %94 {offsets = [0, 0], sizes = [8, 192], strides = [1, 1]} : vector<8x256xf32> to vector<8x192xf32>
    %96 = arith.negf %95 : vector<8x192xf32>
    %97 = math.exp %96 : vector<8x192xf32>
    %cst_15 = arith.constant 1.000000e+00 : f32
    %98 = vector.broadcast %cst_15 : f32 to vector<8x192xf32>
    %99 = arith.addf %98, %97 : vector<8x192xf32>
    %100 = arith.divf %98, %99 : vector<8x192xf32>
    %101 = vector.extract_strided_slice %94 {offsets = [0, 192], sizes = [8, 64], strides = [1, 1]} : vector<8x256xf32> to vector<8x64xf32>
    %102 = math.tanh %101 : vector<8x64xf32>
    %103 = vector.extract_strided_slice %100 {offsets = [0, 0], sizes = [8, 64], strides = [1, 1]} : vector<8x192xf32> to vector<8x64xf32>
    %104 = vector.extract_strided_slice %100 {offsets = [0, 64], sizes = [8, 64], strides = [1, 1]} : vector<8x192xf32> to vector<8x64xf32>
    %105 = vector.extract_strided_slice %100 {offsets = [0, 128], sizes = [8, 64], strides = [1, 1]} : vector<8x192xf32> to vector<8x64xf32>
    %106 = arith.mulf %104, %89 : vector<8x64xf32>
    %107 = arith.mulf %103, %102 : vector<8x64xf32>
    %108 = arith.addf %106, %107 : vector<8x64xf32>
    %109 = math.tanh %108 : vector<8x64xf32>
    %110 = arith.mulf %105, %109 : vector<8x64xf32>
    %111 = vector.extract_strided_slice %8 {offsets = [40, 0], sizes = [8, 256], strides = [1, 1]} : vector<64x256xf32> to vector<8x256xf32>
    %cst_16 = arith.constant dense<0.000000e+00> : vector<8x256xf32>
    %112 = tpu.matmul %110, %9, %cst_16 {dimension_numbers = #tpu.dot_dimension_numbers<[1], [0], [0], [1], [0, 0, 1, 1], [], []>} : vector<8x64xf32>, vector<64x256xf32>, vector<8x256xf32> -> vector<8x256xf32>
    %113 = arith.addf %111, %112 : vector<8x256xf32>
    %114 = vector.extract_strided_slice %113 {offsets = [0, 0], sizes = [8, 192], strides = [1, 1]} : vector<8x256xf32> to vector<8x192xf32>
    %115 = arith.negf %114 : vector<8x192xf32>
    %116 = math.exp %115 : vector<8x192xf32>
    %cst_17 = arith.constant 1.000000e+00 : f32
    %117 = vector.broadcast %cst_17 : f32 to vector<8x192xf32>
    %118 = arith.addf %117, %116 : vector<8x192xf32>
    %119 = arith.divf %117, %118 : vector<8x192xf32>
    %120 = vector.extract_strided_slice %113 {offsets = [0, 192], sizes = [8, 64], strides = [1, 1]} : vector<8x256xf32> to vector<8x64xf32>
    %121 = math.tanh %120 : vector<8x64xf32>
    %122 = vector.extract_strided_slice %119 {offsets = [0, 0], sizes = [8, 64], strides = [1, 1]} : vector<8x192xf32> to vector<8x64xf32>
    %123 = vector.extract_strided_slice %119 {offsets = [0, 64], sizes = [8, 64], strides = [1, 1]} : vector<8x192xf32> to vector<8x64xf32>
    %124 = vector.extract_strided_slice %119 {offsets = [0, 128], sizes = [8, 64], strides = [1, 1]} : vector<8x192xf32> to vector<8x64xf32>
    %125 = arith.mulf %123, %108 : vector<8x64xf32>
    %126 = arith.mulf %122, %121 : vector<8x64xf32>
    %127 = arith.addf %125, %126 : vector<8x64xf32>
    %128 = math.tanh %127 : vector<8x64xf32>
    %129 = arith.mulf %124, %128 : vector<8x64xf32>
    %130 = vector.extract_strided_slice %8 {offsets = [48, 0], sizes = [8, 256], strides = [1, 1]} : vector<64x256xf32> to vector<8x256xf32>
    %cst_18 = arith.constant dense<0.000000e+00> : vector<8x256xf32>
    %131 = tpu.matmul %129, %9, %cst_18 {dimension_numbers = #tpu.dot_dimension_numbers<[1], [0], [0], [1], [0, 0, 1, 1], [], []>} : vector<8x64xf32>, vector<64x256xf32>, vector<8x256xf32> -> vector<8x256xf32>
    %132 = arith.addf %130, %131 : vector<8x256xf32>
    %133 = vector.extract_strided_slice %132 {offsets = [0, 0], sizes = [8, 192], strides = [1, 1]} : vector<8x256xf32> to vector<8x192xf32>
    %134 = arith.negf %133 : vector<8x192xf32>
    %135 = math.exp %134 : vector<8x192xf32>
    %cst_19 = arith.constant 1.000000e+00 : f32
    %136 = vector.broadcast %cst_19 : f32 to vector<8x192xf32>
    %137 = arith.addf %136, %135 : vector<8x192xf32>
    %138 = arith.divf %136, %137 : vector<8x192xf32>
    %139 = vector.extract_strided_slice %132 {offsets = [0, 192], sizes = [8, 64], strides = [1, 1]} : vector<8x256xf32> to vector<8x64xf32>
    %140 = math.tanh %139 : vector<8x64xf32>
    %141 = vector.extract_strided_slice %138 {offsets = [0, 0], sizes = [8, 64], strides = [1, 1]} : vector<8x192xf32> to vector<8x64xf32>
    %142 = vector.extract_strided_slice %138 {offsets = [0, 64], sizes = [8, 64], strides = [1, 1]} : vector<8x192xf32> to vector<8x64xf32>
    %143 = vector.extract_strided_slice %138 {offsets = [0, 128], sizes = [8, 64], strides = [1, 1]} : vector<8x192xf32> to vector<8x64xf32>
    %144 = arith.mulf %142, %127 : vector<8x64xf32>
    %145 = arith.mulf %141, %140 : vector<8x64xf32>
    %146 = arith.addf %144, %145 : vector<8x64xf32>
    %147 = math.tanh %146 : vector<8x64xf32>
    %148 = arith.mulf %143, %147 : vector<8x64xf32>
    %149 = vector.extract_strided_slice %8 {offsets = [56, 0], sizes = [8, 256], strides = [1, 1]} : vector<64x256xf32> to vector<8x256xf32>
    %cst_20 = arith.constant dense<0.000000e+00> : vector<8x256xf32>
    %150 = tpu.matmul %148, %9, %cst_20 {dimension_numbers = #tpu.dot_dimension_numbers<[1], [0], [0], [1], [0, 0, 1, 1], [], []>} : vector<8x64xf32>, vector<64x256xf32>, vector<8x256xf32> -> vector<8x256xf32>
    %151 = arith.addf %149, %150 : vector<8x256xf32>
    %152 = vector.extract_strided_slice %151 {offsets = [0, 0], sizes = [8, 192], strides = [1, 1]} : vector<8x256xf32> to vector<8x192xf32>
    %153 = arith.negf %152 : vector<8x192xf32>
    %154 = math.exp %153 : vector<8x192xf32>
    %cst_21 = arith.constant 1.000000e+00 : f32
    %155 = vector.broadcast %cst_21 : f32 to vector<8x192xf32>
    %156 = arith.addf %155, %154 : vector<8x192xf32>
    %157 = arith.divf %155, %156 : vector<8x192xf32>
    %158 = vector.extract_strided_slice %151 {offsets = [0, 192], sizes = [8, 64], strides = [1, 1]} : vector<8x256xf32> to vector<8x64xf32>
    %159 = math.tanh %158 : vector<8x64xf32>
    %160 = vector.extract_strided_slice %157 {offsets = [0, 0], sizes = [8, 64], strides = [1, 1]} : vector<8x192xf32> to vector<8x64xf32>
    %161 = vector.extract_strided_slice %157 {offsets = [0, 64], sizes = [8, 64], strides = [1, 1]} : vector<8x192xf32> to vector<8x64xf32>
    %162 = vector.extract_strided_slice %157 {offsets = [0, 128], sizes = [8, 64], strides = [1, 1]} : vector<8x192xf32> to vector<8x64xf32>
    %163 = arith.mulf %161, %146 : vector<8x64xf32>
    %164 = arith.mulf %160, %159 : vector<8x64xf32>
    %165 = arith.addf %163, %164 : vector<8x64xf32>
    %166 = math.tanh %165 : vector<8x64xf32>
    %167 = arith.mulf %162, %166 : vector<8x64xf32>
    %168 = vector.extract_strided_slice %8 {offsets = [56, 0], sizes = [8, 256], strides = [1, 1]} : vector<64x256xf32> to vector<8x256xf32>
    %cst_22 = arith.constant dense<0.000000e+00> : vector<8x256xf32>
    %169 = tpu.matmul %167, %9, %cst_22 {dimension_numbers = #tpu.dot_dimension_numbers<[1], [0], [0], [1], [0, 0, 1, 1], [], []>} : vector<8x64xf32>, vector<64x256xf32>, vector<8x256xf32> -> vector<8x256xf32>
    %170 = arith.addf %168, %169 : vector<8x256xf32>
    %171 = vector.extract_strided_slice %170 {offsets = [0, 0], sizes = [8, 192], strides = [1, 1]} : vector<8x256xf32> to vector<8x192xf32>
    %172 = arith.negf %171 : vector<8x192xf32>
    %173 = math.exp %172 : vector<8x192xf32>
    %cst_23 = arith.constant 1.000000e+00 : f32
    %174 = vector.broadcast %cst_23 : f32 to vector<8x192xf32>
    %175 = arith.addf %174, %173 : vector<8x192xf32>
    %176 = arith.divf %174, %175 : vector<8x192xf32>
    %177 = vector.extract_strided_slice %170 {offsets = [0, 192], sizes = [8, 64], strides = [1, 1]} : vector<8x256xf32> to vector<8x64xf32>
    %178 = math.tanh %177 : vector<8x64xf32>
    %179 = vector.extract_strided_slice %176 {offsets = [0, 0], sizes = [8, 64], strides = [1, 1]} : vector<8x192xf32> to vector<8x64xf32>
    %180 = vector.extract_strided_slice %176 {offsets = [0, 64], sizes = [8, 64], strides = [1, 1]} : vector<8x192xf32> to vector<8x64xf32>
    %181 = vector.extract_strided_slice %176 {offsets = [0, 128], sizes = [8, 64], strides = [1, 1]} : vector<8x192xf32> to vector<8x64xf32>
    %182 = arith.mulf %180, %165 : vector<8x64xf32>
    %183 = arith.mulf %179, %178 : vector<8x64xf32>
    %184 = arith.addf %182, %183 : vector<8x64xf32>
    %185 = math.tanh %184 : vector<8x64xf32>
    %186 = arith.mulf %181, %185 : vector<8x64xf32>
    %c0_24 = arith.constant 0 : index
    %c0_25 = arith.constant 0 : index
    %187 = vector.load %arg4[%c0_24, %c0_25] : memref<1x64xf32, #tpu.memory_space<vmem>>, vector<1x64xf32>
    %188 = vector.broadcast %187 : vector<1x64xf32> to vector<8x64xf32>
    %189 = arith.mulf %186, %188 : vector<8x64xf32>
    %cst_26 = arith.constant dense<0.000000e+00> : vector<8xf32>
    %190 = vector.multi_reduction <add>, %189, %cst_26 [1] : vector<8x64xf32> to vector<8xf32>
    %191 = vector.shape_cast %190 : vector<8xf32> to vector<8x1xf32>
    %c0_27 = arith.constant 0 : index
    %c0_28 = arith.constant 0 : index
    %192 = vector.load %arg5[%c0_27, %c0_28] : memref<1x1xf32, #tpu.memory_space<vmem>>, vector<1x1xf32>
    %193 = vector.broadcast %192 : vector<1x1xf32> to vector<8x1xf32>
    %194 = arith.addf %191, %193 : vector<8x1xf32>
    %195 = arith.negf %194 : vector<8x1xf32>
    %196 = math.exp %195 : vector<8x1xf32>
    %cst_29 = arith.constant 1.000000e+00 : f32
    %197 = vector.broadcast %cst_29 : f32 to vector<8x1xf32>
    %198 = arith.addf %197, %196 : vector<8x1xf32>
    %199 = arith.divf %197, %198 : vector<8x1xf32>
    %c0_30 = arith.constant 0 : index
    %c0_31 = arith.constant 0 : index
    %200 = vector.load %arg6[%c0_30, %c0_31] : memref<8x1xf32, #tpu.memory_space<vmem>>, vector<8x1xf32>
    tpu.vector_store %arg6[%c0_30, %c0_31], %199 {strides = array<i32>} : memref<8x1xf32, #tpu.memory_space<vmem>>, vector<8x1xf32>,
    return
  }
  func.func @transform_0(%arg0: i32) -> (i32, i32, i32) {
    %c0_i32 = arith.constant 0 : i32
    %c0_i32_0 = arith.constant 0 : i32
    %c0_i32_1 = arith.constant 0 : i32
    return %arg0, %c0_i32, %c0_i32_0 : i32, i32, i32
  }
  func.func @transform_1(%arg0: i32) -> (i32, i32) {
    %c0_i32 = arith.constant 0 : i32
    %c0_i32_0 = arith.constant 0 : i32
    %c0_i32_1 = arith.constant 0 : i32
    return %c0_i32, %c0_i32_0 : i32, i32
  }
  func.func @transform_2(%arg0: i32) -> (i32, i32) {
    %c0_i32 = arith.constant 0 : i32
    %c0_i32_0 = arith.constant 0 : i32
    %c0_i32_1 = arith.constant 0 : i32
    return %c0_i32, %c0_i32_0 : i32, i32
  }
  func.func @transform_3(%arg0: i32) -> (i32, i32) {
    %c0_i32 = arith.constant 0 : i32
    %c0_i32_0 = arith.constant 0 : i32
    %c0_i32_1 = arith.constant 0 : i32
    return %c0_i32, %c0_i32_0 : i32, i32
  }
  func.func @transform_4(%arg0: i32) -> (i32, i32) {
    %c0_i32 = arith.constant 0 : i32
    %c0_i32_0 = arith.constant 0 : i32
    %c0_i32_1 = arith.constant 0 : i32
    return %c0_i32, %c0_i32_0 : i32, i32
  }
  func.func @transform_5(%arg0: i32) -> (i32, i32) {
    %c0_i32 = arith.constant 0 : i32
    %c0_i32_0 = arith.constant 0 : i32
    return %arg0, %c0_i32 : i32, i32
  }
}

</mosaic_0001>

<bundles_post_ra>
// kernel: mul.14
= control target key start
LH: loop header
LB: loop body
LE: loop exit
PB: predicated region body
PF: predicated region fallthrough
CT: control target
= control target key end

     0   :  { %s58_s0 = inlined_call_operand.vmem [shape: f32[32], index: 0, kind: input, shape index: {}]   ;;  %s59_s1 = inlined_call_operand.vmem [shape: f32[50,32], index: 1, kind: output, shape index: {}]  }
   0x1   :  { %v4_v0 = vld [vmem:[%s58_s0] ss:$0 sm:$0xff] }
   0x2   :  { %5 = vst [vmem:[%s59_s1] sm:$0xff] %v4_v0  ;;  %18 = vst [vmem:[%s59_s1 + $0x8] sm:$0xff] %v4_v0 }
   0x3   :  { %19 = vst [vmem:[%s59_s1 + $0x10] sm:$0xff] %v4_v0  ;;  %20 = vst [vmem:[%s59_s1 + $0x18] sm:$0xff] %v4_v0 }
   0x4   :  { %21 = vst [vmem:[%s59_s1 + $0x20] sm:$0xff] %v4_v0  ;;  %22 = vst [vmem:[%s59_s1 + $0x28] sm:$0xff] %v4_v0 }
   0x5   :  { %23 = vst [vmem:[%s59_s1 + $0x30] sm:$0xff] %v4_v0 }

// kernel: sentiment_forward.1
= control target key start
LH: loop header
LB: loop body
LE: loop exit
PB: predicated region body
PF: predicated region fallthrough
CT: control target
= control target key end

     0   :  { %vm119_vm0 = vcmask 1041408   ;;  %v1339_v0 = vmov 0   ;;  %v1340_v4 = vmov 0.0   ;;  %v30_v17 = vlaneseq  ;;  %s1772_s0 = inlined_call_operand.vmem [shape: s32[1,64,1], index: 0, kind: input, shape index: {}]   ;;  %s1773_s1 = inlined_call_operand.vmem [shape: f32[50,256], index: 1, kind: input, shape index: {}]   ;;  %s1774_s2 = inlined_call_operand.vmem [shape: f32[64,256], index: 2, kind: input, shape index: {}]   ;;  %s1775_s4 = inlined_call_operand.<no memory space> [shape: f32[1,1], index: 4, kind: input, shape index: {}]   ;;  %s1776_s3 = inlined_call_operand.vmem [shape: f32[1,64], index: 3, kind: input, shape index: {}]   ;;  %s1777_s5 = inlined_call_operand.vmem [shape: f32[8,1], index: 5, kind: output, shape index: {}]  }
   0x1   :  { %1225 = vset.pattern.permute.xlu0 %v1339_v0  ;;  %v22_v1 = vld [vmem:[%s1772_s0] sm:$0xff]  ;;  %v93_v2 = vld [vmem:[%s1773_s1 + $0x68] sm:$0x3]  ;;  %190 = vmatprep.mubr.f32.mxu0 %v1340_v4  ;;  %v91_v5 = vld [vmem:[%s1773_s1 + $0x58] sm:$0xff]  ;;  %vm94_vm1 = vcmask 408576   ;;  %vm294_vm5 = vcmask 523264  }
   0x2   :  { %v92_v3 = vld [vmem:[%s1773_s1 + $0x60] sm:$0x3]  ;;  %33 = vperm.xlu0 %1225, %v22_v1   ;;  %1182 = vmatprep.subr.msk.mxu0 %vm119_vm0, %v93_v2  ;;  %v90_v6 = vld [vmem:[%s1773_s1 + $0x50] sm:$0xff]  ;;  %v89_v7 = vld [vmem:[%s1773_s1 + $0x48] sm:$0xff]  ;;  %v1419_v18 = vand.u32 127, %v30_v17  ;;  %vm1168_vm12 = vcmask 7168  }
   0x3   :  { %1183 = vmatpush1.msk.msra.mxu0 %vm119_vm0, %v92_v3  ;;  %1226 = vset.pattern.permute.xlu1 %v1339_v0  ;;  %v88_v8 = vld [vmem:[%s1773_s1 + $0x40] sm:$0xff]  ;;  %v87_v9 = vld [vmem:[%s1773_s1 + $0x38] sm:$0xff]  ;;  %v86_v10 = vld [vmem:[%s1773_s1 + $0x30] sm:$0xff] }
   0x4   :  { %146 = vmatprep.subr.mxu0 %v91_v5  ;;  %362 = vmatprep.mubr.f32.mxu1 %v1340_v4  ;;  %v85_v11 = vld [vmem:[%s1773_s1 + $0x28] sm:$0xff]  ;;  %v84_v12 = vld [vmem:[%s1773_s1 + $0x20] sm:$0xff]  ;;  %v83_v13 = vld [vmem:[%s1773_s1 + $0x18] sm:$0xff]  ;;  %vm285_vm4 = vcmp.lt.s32.totalorder %v1419_v18, 32 }
   0x5   :  { %147 = vmatpush1.msra.mxu0 %v90_v6  ;;  %v82_v14 = vld [vmem:[%s1773_s1 + $0x10] sm:$0xff]  ;;  %v81_v15 = vld [vmem:[%s1773_s1 + $0x8] sm:$0xff]  ;;  %v80_v16 = vld [vmem:[%s1773_s1] sm:$0xff]  ;;  %s1341_s1 = smov 64   ;;  %v1194_v53 = vsel %vm285_vm4, 1.0, %v1340_v4 }
   0x6   :  { %148 = vmatprep.subr.mxu0 %v89_v7  ;;  %v23_v30 = vld [vmem:[%s1772_s0 + $0x8] sm:$0xff]  ;;  %v1436_v31 = vld [vmem:[%s1774_s2 + $0x78] sm:$0xff]  ;;  %v1441_v32 = vld [vmem:[%s1774_s2 + $0x70] sm:$0xff] }
   0x7   :  { %149 = vmatpush1.msra.mxu0 %v88_v8  ;;  %v1446_v33 = vld [vmem:[%s1774_s2 + $0x68] sm:$0xff]  ;;  %314 = vmatprep.subr.mxu1 %v1436_v31  ;;  %v1452_v34 = vld [vmem:[%s1774_s2 + $0x60] sm:$0xff]  ;;  %v1459_v35 = vld [vmem:[%s1774_s2 + $0x58] sm:$0xff] }
   0x8   :  { %150 = vmatprep.subr.mxu0 %v87_v9  ;;  %315 = vmatpush1.msra.mxu1 %v1441_v32  ;;  %v1466_v36 = vld [vmem:[%s1774_s2 + $0x50] sm:$0xff]  ;;  %v1473_v37 = vld [vmem:[%s1774_s2 + $0x48] sm:$0xff]  ;;  %v1480_v38 = vld [vmem:[%s1774_s2 + $0x40] sm:$0xff] }
   0x9   :  { %151 = vmatpush1.msra.mxu0 %v86_v10  ;;  %316 = vmatprep.subr.mxu1 %v1446_v33  ;;  %v1487_v39 = vld [vmem:[%s1774_s2 + $0x38] sm:$0xff]  ;;  %v1494_v40 = vld [vmem:[%s1774_s2 + $0x30] sm:$0xff]  ;;  %v1501_v41 = vld [vmem:[%s1774_s2 + $0x28] sm:$0xff] }
   0xa   :  { %152 = vmatprep.subr.mxu0 %v85_v11  ;;  %317 = vmatpush1.msra.mxu1 %v1452_v34  ;;  %v1508_v42 = vld [vmem:[%s1774_s2 + $0x20] sm:$0xff]  ;;  %v1523_v46 = vld [vmem:[%s1774_s2 + $0x18] sm:$0xff]  ;;  %v1529_v47 = vld [vmem:[%s1774_s2 + $0x10] sm:$0xff] }
   0xb   :  { %153 = vmatpush1.msra.mxu0 %v84_v12  ;;  %318 = vmatprep.subr.mxu1 %v1459_v35  ;;  %v1536_v48 = vld [vmem:[%s1774_s2 + $0x8] sm:$0xff]  ;;  %v1543_v49 = vld [vmem:[%s1774_s2] sm:$0xff]  ;;  %v24_v54 = vld [vmem:[%s1772_s0 + $0x10] sm:$0xff] }
   0xc   :  { %154 = vmatprep.subr.mxu0 %v83_v13  ;;  %319 = vmatpush1.msra.mxu1 %v1466_v36 }
   0xd   :  { %155 = vmatpush1.msra.mxu0 %v82_v14  ;;  %320 = vmatprep.subr.mxu1 %v1473_v37 }
   0xe   :  { %156 = vmatprep.subr.mxu0 %v81_v15  ;;  %321 = vmatpush1.msra.mxu1 %v1480_v38 }
   0xf   :  { %157 = vmatpush1.msra.mxu0 %v80_v16  ;;  %322 = vmatprep.subr.mxu1 %v1487_v39 }
  0x10   :  { %526 = vmatprep.subr.mxu0 %v1436_v31  ;;  %323 = vmatpush1.msra.mxu1 %v1494_v40 }
  0x11   :  { %324 = vmatprep.subr.mxu1 %v1501_v41 }
  0x12   :  { %325 = vmatpush1.msra.mxu1 %v1508_v42 }
  0x13   :  { %326 = vmatprep.subr.mxu1 %v1523_v46 }
  0x14   :  { %327 = vmatpush1.msra.mxu1 %v1529_v47 }
  0x15   :  { %328 = vmatprep.subr.mxu1 %v1536_v48 }
  0x16   :  { %329 = vmatpush1.msra.mxu1 %v1543_v49 }
  0x17   :  { %420 = vmatprep.subr.mxu1 %v1436_v31 }
  0x7d   :  { %v34_v19 = vpop.permute.xlu0 %33 }
  0x7e   :  { %vm56_vm2 = vcmp.eq.s32.totalorder %v1419_v18, %v34_v19 }
  0x7f   :  { %v1174_v20 = vsel %vm56_vm2, 1.0, %v1340_v4 }
  0x80   :  { %1184 = vmatmul.mubr.msk.f32.vlgmr.msra.gmra.mxu0 %vm94_vm1, %v1174_v20 }
  0x81   :  { %196 = vmatprep.mubr.f32.mxu0 %v1340_v4  ;;  %527 = vmatpush1.msra.mxu0 %v1441_v32 }
  0x82   :  { %528 = vmatprep.subr.mxu0 %v1446_v33 }
  0x83   :  { %529 = vmatpush1.msra.mxu0 %v1452_v34 }
  0x84   :  { %530 = vmatprep.subr.mxu0 %v1459_v35 }
  0x85   :  { %531 = vmatpush1.msra.mxu0 %v1466_v36 }
  0x86   :  { %532 = vmatprep.subr.mxu0 %v1473_v37 }
  0x87   :  { %533 = vmatpush1.msra.mxu0 %v1480_v38 }
  0x88   :  { %534 = vmatprep.subr.mxu0 %v1487_v39 }
  0x89   :  { %535 = vmatpush1.msra.mxu0 %v1494_v40 }
  0x8a   :  { %536 = vmatprep.subr.mxu0 %v1501_v41 }
  0x8b   :  { %537 = vmatpush1.msra.mxu0 %v1508_v42 }
  0x8c   :  { %538 = vmatprep.subr.mxu0 %v1523_v46 }
  0x8d   :  { %539 = vmatpush1.msra.mxu0 %v1529_v47 }
  0x8e   :  { %540 = vmatprep.subr.mxu0 %v1536_v48 }
  0x8f   :  { %541 = vmatpush1.msra.mxu0 %v1543_v49 }
  0x90   :  { %738 = vmatprep.subr.mxu0 %v1436_v31 }
 0x140   :  { %v192_v21 = vpop.f32.mrf.mxu0 }
 0x141   :  { %v1192_v24 = vmul.f32 -1.442695, %v192_v21 }
 0x142   :  { %v1425_v22 = vpop.f32.mrf.mxu0 }
 0x143   :  { %1227 = vtanh.f32 %v1425_v22  ;;  %v1193_v55 = vmul.f32 -1.442695, %v1425_v22 }
 0x144   :  { %1229 = vpow2.f32 %v1192_v24 }
 0x150   :  { %v1228_v23 = vpop.eup %1227 }
 0x151   :  { %270 = vrot.lane.b32.xlu0 %v1228_v23, %s1341_s1  ;;  %v1230_v25 = vpop.eup %1229 }
 0x152   :  { %v261_v26 = vadd.f32 1.0, %v1230_v25 }
 0x154   :  { %1231 = vrcp.f32 %v261_v26 }
 0x161   :  { %v1232_v27 = vpop.eup %1231 }
 0x162   :  { %v268_v43 = vmul.f32 0.0, %v1232_v27 }
 0x1c3   :  { %v271_v28 = vpop.permute.xlu0 %270 }
 0x1c4   :  { %v273_v29 = vmul.f32 %v1232_v27, %v271_v28 }
 0x1c6   :  { %275 = vrot.lane.b32.xlu1 %v273_v29, %s1341_s1 }
 0x1ca   :  { %36 = vperm.xlu1 %1226, %v23_v30  }
 0x238   :  { %v276_v44 = vpop.permute.xlu1 %275 }
 0x239   :  { %v1517_v45 = vadd.f32 %v276_v44, %v268_v43 }
 0x23b   :  { %1233 = vtanh.f32 %v1517_v45 }
 0x23c   :  { %1235 = vpow2.f32 %v1193_v55 }
 0x245   :  { %v37_v50 = vpop.permute.xlu1 %36 }
 0x246   :  { %vm57_vm3 = vcmp.eq.s32.totalorder %v1419_v18, %v37_v50  ;;  %v27_v50 = vld [vmem:[%s1772_s0 + $0x28] sm:$0xff] }
 0x247   :  { %v1175_v51 = vsel %vm57_vm3, 1.0, %v1340_v4 }
 0x248   :  { %v1234_v52 = vpop.eup %1233  ;;  %1185 = vmatmul.mubr.msk.f32.gmra.mxu0 %vm94_vm1, %v1175_v51  ;;  %v29_v51 = vld [vmem:[%s1772_s0 + $0x38] sm:$0xff] }
 0x249   :  { %281 = vrot.lane.b32.xlu0 %v1234_v52, %s1341_s1  ;;  %202 = vmatprep.mubr.f32.mxu0 %v1340_v4  ;;  %v1236_v56 = vpop.eup %1235 }
 0x24a   :  { %v262_v57 = vadd.f32 1.0, %v1236_v56 }
 0x24c   :  { %1237 = vrcp.f32 %v262_v57 }
 0x24d   :  { %290 = vrot.lane.b32.xlu0 %v1194_v53, %s1341_s1 }
 0x251   :  { %39 = vperm.xlu0 %1225, %v24_v54  }
 0x259   :  { %v1238_v58 = vpop.eup %1237 }
 0x2bb   :  { %v282_v59 = vpop.permute.xlu0 %281 }
 0x2bc   :  { %v284_v60 = vmul.f32 %v1238_v58, %v282_v59  ;;  %v26_v59 = vld [vmem:[%s1772_s0 + $0x20] sm:$0xff] }
 0x2be   :  { %v288_v61 = vmul.f32 %v1194_v53, %v284_v60  ;;  %v28_v60 = vld [vmem:[%s1772_s0 + $0x30] sm:$0xff] }
 0x2bf   :  { %v291_v62 = vpop.permute.xlu0 %290 }
 0x2c0   :  { %1195 = vmatmul.mubr.msk.f32.vlgmr.msra.gmra.mxu1 %vm294_vm5, %v288_v61  ;;  %v293_v15 = vmul.f32 %v291_v62, %v1517_v45  ;;  %v25_v45 = vld [vmem:[%s1772_s0 + $0x18] sm:$0xff] }
 0x2c1   :  { %421 = vmatpush1.msra.mxu1 %v1441_v32  ;;  %468 = vmatprep.mubr.f32.mxu1 %v1340_v4 }
 0x2c2   :  { %422 = vmatprep.subr.mxu1 %v1446_v33 }
 0x2c3   :  { %423 = vmatpush1.msra.mxu1 %v1452_v34 }
 0x2c4   :  { %424 = vmatprep.subr.mxu1 %v1459_v35 }
 0x2c5   :  { %425 = vmatpush1.msra.mxu1 %v1466_v36 }
 0x2c6   :  { %426 = vmatprep.subr.mxu1 %v1473_v37 }
 0x2c7   :  { %427 = vmatpush1.msra.mxu1 %v1480_v38 }
 0x2c8   :  { %428 = vmatprep.subr.mxu1 %v1487_v39 }
 0x2c9   :  { %429 = vmatpush1.msra.mxu1 %v1494_v40 }
 0x2ca   :  { %430 = vmatprep.subr.mxu1 %v1501_v41 }
 0x2cb   :  { %431 = vmatpush1.msra.mxu1 %v1508_v42 }
 0x2cc   :  { %v40_v63 = vpop.permute.xlu0 %39  ;;  %432 = vmatprep.subr.mxu1 %v1523_v46 }
 0x2cd   :  { %vm58_vm6 = vcmp.eq.s32.totalorder %v1419_v18, %v40_v63  ;;  %433 = vmatpush1.msra.mxu1 %v1529_v47 }
 0x2ce   :  { %v1176_v0 = vsel %vm58_vm6, 1.0, %v1340_v4  ;;  %434 = vmatprep.subr.mxu1 %v1536_v48 }
 0x2cf   :  { %1186 = vmatmul.mubr.msk.f32.gmra.mxu0 %vm94_vm1, %v1176_v0  ;;  %435 = vmatpush1.msra.mxu1 %v1543_v49 }
 0x2d0   :  { %208 = vmatprep.mubr.f32.mxu0 %v1340_v4  ;;  %632 = vmatprep.subr.mxu1 %v1436_v31 }
 0x308   :  { %v198_v1 = vpop.f32.mrf.mxu0 }
 0x30a   :  { %v200_v3 = vpop.f32.mrf.mxu0 }
 0x380   :  { %v364_v2 = vpop.f32.mrf.mxu1 }
 0x381   :  { %v369_v8 = vadd.f32 %v364_v2, %v198_v1 }
 0x382   :  { %v366_v5 = vpop.f32.mrf.mxu1 }
 0x383   :  { %v370_v6 = vadd.f32 %v366_v5, %v200_v3  ;;  %v1196_v9 = vmul.f32 -1.442695, %v369_v8 }
 0x385   :  { %1239 = vtanh.f32 %v370_v6  ;;  %v1197_v21 = vmul.f32 -1.442695, %v370_v6 }
 0x386   :  { %1241 = vpow2.f32 %v1196_v9 }
 0x38f   :  { %v204_v27 = vpop.f32.mrf.mxu0 }
 0x391   :  { %v206_v29 = vpop.f32.mrf.mxu0 }
 0x392   :  { %v1240_v7 = vpop.eup %1239 }
 0x393   :  { %386 = vrot.lane.b32.xlu1 %v1240_v7, %s1341_s1  ;;  %v1242_v10 = vpop.eup %1241 }
 0x394   :  { %v377_v11 = vadd.f32 1.0, %v1242_v10 }
 0x396   :  { %1243 = vrcp.f32 %v377_v11 }
 0x3a3   :  { %v1244_v12 = vpop.eup %1243 }
 0x3a4   :  { %v384_v16 = vmul.f32 %v1244_v12, %v293_v15 }
 0x405   :  { %v387_v13 = vpop.permute.xlu1 %386 }
 0x406   :  { %v389_v14 = vmul.f32 %v1244_v12, %v387_v13 }
 0x408   :  { %391 = vrot.lane.b32.xlu1 %v389_v14, %s1341_s1 }
 0x47a   :  { %v392_v17 = vpop.permute.xlu1 %391 }
 0x47b   :  { %v1587_v19 = vadd.f32 %v392_v17, %v384_v16 }
 0x47d   :  { %1245 = vtanh.f32 %v1587_v19 }
 0x47e   :  { %1247 = vpow2.f32 %v1197_v21 }
 0x48a   :  { %v1246_v20 = vpop.eup %1245 }
 0x48b   :  { %397 = vrot.lane.b32.xlu1 %v1246_v20, %s1341_s1  ;;  %v1248_v22 = vpop.eup %1247 }
 0x48c   :  { %v378_v23 = vadd.f32 1.0, %v1248_v22 }
 0x48e   :  { %1249 = vrcp.f32 %v378_v23 }
 0x49b   :  { %v1250_v24 = vpop.eup %1249 }
 0x4fd   :  { %v398_v25 = vpop.permute.xlu1 %397 }
 0x4fe   :  { %v400_v26 = vmul.f32 %v1250_v24, %v398_v25 }
 0x500   :  { %1198 = vmatmul.mubr.msk.f32.vlgmr.msra.gmra.mxu1 %vm294_vm5, %v400_v26 }
 0x501   :  { %633 = vmatpush1.msra.mxu1 %v1441_v32  ;;  %680 = vmatprep.mubr.f32.mxu1 %v1340_v4 }
 0x502   :  { %634 = vmatprep.subr.mxu1 %v1446_v33 }
 0x503   :  { %635 = vmatpush1.msra.mxu1 %v1452_v34 }
 0x504   :  { %636 = vmatprep.subr.mxu1 %v1459_v35 }
 0x505   :  { %637 = vmatpush1.msra.mxu1 %v1466_v36 }
 0x506   :  { %638 = vmatprep.subr.mxu1 %v1473_v37 }
 0x507   :  { %639 = vmatpush1.msra.mxu1 %v1480_v38 }
 0x508   :  { %640 = vmatprep.subr.mxu1 %v1487_v39 }
 0x509   :  { %641 = vmatpush1.msra.mxu1 %v1494_v40 }
 0x50a   :  { %642 = vmatprep.subr.mxu1 %v1501_v41 }
 0x50b   :  { %643 = vmatpush1.msra.mxu1 %v1508_v42 }
 0x50c   :  { %644 = vmatprep.subr.mxu1 %v1523_v46 }
 0x50d   :  { %645 = vmatpush1.msra.mxu1 %v1529_v47 }
 0x50e   :  { %646 = vmatprep.subr.mxu1 %v1536_v48 }
 0x50f   :  { %647 = vmatpush1.msra.mxu1 %v1543_v49 }
 0x510   :  { %844 = vmatprep.subr.mxu1 %v1436_v31 }
 0x5c0   :  { %v470_v28 = vpop.f32.mrf.mxu1 }
 0x5c1   :  { %v475_v52 = vadd.f32 %v470_v28, %v204_v27 }
 0x5c2   :  { %v472_v30 = vpop.f32.mrf.mxu1 }
 0x5c3   :  { %v476_v43 = vadd.f32 %v472_v30, %v206_v29  ;;  %v1199_v53 = vmul.f32 -1.442695, %v475_v52 }
 0x5c5   :  { %1251 = vtanh.f32 %v476_v43  ;;  %v1200_v12 = vmul.f32 -1.442695, %v476_v43 }
 0x5c6   :  { %1253 = vpow2.f32 %v1199_v53 }
 0x5d2   :  { %v1252_v44 = vpop.eup %1251 }
 0x5d3   :  { %492 = vrot.lane.b32.xlu0 %v1252_v44, %s1341_s1  ;;  %v1254_v54 = vpop.eup %1253 }
 0x5d4   :  { %v483_v55 = vadd.f32 1.0, %v1254_v54 }
 0x5d6   :  { %1255 = vrcp.f32 %v483_v55 }
 0x5d7   :  { %42 = vperm.xlu0 %1225, %v25_v45  }
 0x5db   :  { %48 = vperm.xlu0 %1225, %v27_v50  }
 0x5df   :  { %54 = vperm.xlu0 %1225, %v29_v51  }
 0x5e3   :  { %v1256_v56 = vpop.eup %1255 }
 0x5e4   :  { %v490_v63 = vmul.f32 %v1256_v56, %v1587_v19 }
 0x645   :  { %v493_v57 = vpop.permute.xlu0 %492 }
 0x646   :  { %v495_v58 = vmul.f32 %v1256_v56, %v493_v57 }
 0x648   :  { %497 = vrot.lane.b32.xlu1 %v495_v58, %s1341_s1 }
 0x64c   :  { %45 = vperm.xlu1 %1226, %v26_v59  }
 0x650   :  { %51 = vperm.xlu1 %1226, %v28_v60  }
 0x652   :  { %v43_v61 = vpop.permute.xlu0 %42 }
 0x653   :  { %vm59_vm7 = vcmp.eq.s32.totalorder %v1419_v18, %v43_v61 }
 0x654   :  { %v1177_v62 = vsel %vm59_vm7, 1.0, %v1340_v4 }
 0x655   :  { %1187 = vmatmul.mubr.msk.f32.gmra.mxu0 %vm94_vm1, %v1177_v62 }
 0x656   :  { %214 = vmatprep.mubr.f32.mxu0 %v1340_v4  ;;  %v49_v2 = vpop.permute.xlu0 %48 }
 0x657   :  { %vm61_vm9 = vcmp.eq.s32.totalorder %v1419_v18, %v49_v2 }
 0x658   :  { %v1179_v8 = vsel %vm61_vm9, 1.0, %v1340_v4 }
 0x65a   :  { %v55_v9 = vpop.permute.xlu0 %54 }
 0x65b   :  { %vm63_vm11 = vcmp.eq.s32.totalorder %v1419_v18, %v55_v9 }
 0x65c   :  { %v1181_v11 = vsel %vm63_vm11, 1.0, %v1340_v4 }
 0x6ba   :  { %v498_v0 = vpop.permute.xlu1 %497 }
 0x6bb   :  { %v1631_v1 = vadd.f32 %v498_v0, %v490_v63 }
 0x6bd   :  { %1257 = vtanh.f32 %v1631_v1 }
 0x6be   :  { %1259 = vpow2.f32 %v1200_v12 }
 0x6c7   :  { %v46_v3 = vpop.permute.xlu1 %45 }
 0x6c8   :  { %vm60_vm8 = vcmp.eq.s32.totalorder %v1419_v18, %v46_v3 }
 0x6c9   :  { %v1178_v5 = vsel %vm60_vm8, 1.0, %v1340_v4 }
 0x6ca   :  { %v1258_v6 = vpop.eup %1257  ;;  %1188 = vmatmul.mubr.msk.f32.gmra.mxu0 %vm94_vm1, %v1178_v5 }
 0x6cb   :  { %503 = vrot.lane.b32.xlu1 %v1258_v6, %s1341_s1  ;;  %v52_v7 = vpop.permute.xlu1 %51  ;;  %220 = vmatprep.mubr.f32.mxu0 %v1340_v4  ;;  %v1260_v13 = vpop.eup %1259 }
 0x6cc   :  { %vm62_vm10 = vcmp.eq.s32.totalorder %v1419_v18, %v52_v7  ;;  %v484_v14 = vadd.f32 1.0, %v1260_v13 }
 0x6cd   :  { %v1180_v10 = vsel %vm62_vm10, 1.0, %v1340_v4 }
 0x6ce   :  { %1189 = vmatmul.mubr.msk.f32.gmra.mxu0 %vm94_vm1, %v1179_v8  ;;  %1261 = vrcp.f32 %v484_v14 }
 0x6cf   :  { %226 = vmatprep.mubr.f32.mxu0 %v1340_v4 }
 0x6d2   :  { %1190 = vmatmul.mubr.msk.f32.gmra.mxu0 %vm94_vm1, %v1180_v10 }
 0x6d3   :  { %232 = vmatprep.mubr.f32.mxu0 %v1340_v4 }
 0x6d6   :  { %1191 = vmatmul.mubr.msk.f32.gmra.mxu0 %vm94_vm1, %v1181_v11 }
 0x6d7   :  { %574 = vmatprep.mubr.f32.mxu0 %v1340_v4 }
 0x6db   :  { %v1262_v15 = vpop.eup %1261 }
 0x715   :  { %v210_v18 = vpop.f32.mrf.mxu0 }
 0x717   :  { %v212_v19 = vpop.f32.mrf.mxu0 }
 0x73d   :  { %v504_v16 = vpop.permute.xlu1 %503 }
 0x73e   :  { %v506_v17 = vmul.f32 %v1262_v15, %v504_v16 }
 0x740   :  { %1201 = vmatmul.mubr.msk.f32.vlgmr.msra.gmra.mxu0 %vm294_vm5, %v506_v17 }
 0x741   :  { %739 = vmatpush1.msra.mxu0 %v1441_v32  ;;  %786 = vmatprep.mubr.f32.mxu0 %v1340_v4 }
 0x742   :  { %740 = vmatprep.subr.mxu0 %v1446_v33 }
 0x743   :  { %741 = vmatpush1.msra.mxu0 %v1452_v34 }
 0x744   :  { %742 = vmatprep.subr.mxu0 %v1459_v35 }
 0x745   :  { %743 = vmatpush1.msra.mxu0 %v1466_v36 }
 0x746   :  { %744 = vmatprep.subr.mxu0 %v1473_v37 }
 0x747   :  { %745 = vmatpush1.msra.mxu0 %v1480_v38 }
 0x748   :  { %746 = vmatprep.subr.mxu0 %v1487_v39 }
 0x749   :  { %747 = vmatpush1.msra.mxu0 %v1494_v40 }
 0x74a   :  { %748 = vmatprep.subr.mxu0 %v1501_v41 }
 0x74b   :  { %749 = vmatpush1.msra.mxu0 %v1508_v42 }
 0x74c   :  { %750 = vmatprep.subr.mxu0 %v1523_v46 }
 0x74d   :  { %751 = vmatpush1.msra.mxu0 %v1529_v47 }
 0x74e   :  { %752 = vmatprep.subr.mxu0 %v1536_v48 }
 0x74f   :  { %753 = vmatpush1.msra.mxu0 %v1543_v49 }
 0x750   :  { %950 = vmatprep.subr.mxu0 %v1436_v31 }
 0x78a   :  { %v216_v20 = vpop.f32.mrf.mxu0 }
 0x78c   :  { %v218_v21 = vpop.f32.mrf.mxu0 }
 0x78e   :  { %v1669_v22 = vpop.f32.mrf.mxu0 }
 0x790   :  { %v1671_v23 = vpop.f32.mrf.mxu0 }
 0x792   :  { %v1673_v24 = vpop.f32.mrf.mxu0 }
 0x794   :  { %v1675_v25 = vpop.f32.mrf.mxu0 }
 0x796   :  { %v1677_v26 = vpop.f32.mrf.mxu0 }
 0x798   :  { %v1679_v27 = vpop.f32.mrf.mxu0 }
 0x800   :  { %v576_v28 = vpop.f32.mrf.mxu0 }
 0x801   :  { %v581_v44 = vadd.f32 %v576_v28, %v210_v18 }
 0x802   :  { %v578_v29 = vpop.f32.mrf.mxu0 }
 0x803   :  { %v582_v30 = vadd.f32 %v578_v29, %v212_v19  ;;  %v1202_v45 = vmul.f32 -1.442695, %v581_v44 }
 0x805   :  { %1263 = vtanh.f32 %v582_v30  ;;  %v1203_v59 = vmul.f32 -1.442695, %v582_v30 }
 0x806   :  { %1265 = vpow2.f32 %v1202_v45 }
 0x812   :  { %v1264_v43 = vpop.eup %1263 }
 0x813   :  { %598 = vrot.lane.b32.xlu0 %v1264_v43, %s1341_s1  ;;  %v1266_v50 = vpop.eup %1265 }
 0x814   :  { %v589_v51 = vadd.f32 1.0, %v1266_v50 }
 0x816   :  { %1267 = vrcp.f32 %v589_v51 }
 0x823   :  { %v1268_v52 = vpop.eup %1267 }
 0x824   :  { %v596_v55 = vmul.f32 %v1268_v52, %v1631_v1 }
 0x885   :  { %v599_v53 = vpop.permute.xlu0 %598 }
 0x886   :  { %v601_v54 = vmul.f32 %v1268_v52, %v599_v53 }
 0x888   :  { %603 = vrot.lane.b32.xlu1 %v601_v54, %s1341_s1 }
 0x8fa   :  { %v604_v56 = vpop.permute.xlu1 %603 }
 0x8fb   :  { %v606_v57 = vadd.f32 %v604_v56, %v596_v55 }
 0x8fd   :  { %1269 = vtanh.f32 %v606_v57 }
 0x8fe   :  { %1271 = vpow2.f32 %v1203_v59 }
 0x90a   :  { %v1270_v58 = vpop.eup %1269 }
 0x90b   :  { %609 = vrot.lane.b32.xlu0 %v1270_v58, %s1341_s1  ;;  %v1272_v60 = vpop.eup %1271 }
 0x90c   :  { %v590_v61 = vadd.f32 1.0, %v1272_v60 }
 0x90e   :  { %1273 = vrcp.f32 %v590_v61 }
 0x91b   :  { %v1274_v62 = vpop.eup %1273 }
 0x97d   :  { %v610_v63 = vpop.permute.xlu0 %609 }
 0x97e   :  { %v612_v0 = vmul.f32 %v1274_v62, %v610_v63 }
 0x980   :  { %1204 = vmatmul.mubr.msk.f32.vlgmr.msra.gmra.mxu1 %vm294_vm5, %v612_v0 }
 0x981   :  { %845 = vmatpush1.msra.mxu1 %v1441_v32  ;;  %892 = vmatprep.mubr.f32.mxu1 %v1340_v4 }
 0x982   :  { %846 = vmatprep.subr.mxu1 %v1446_v33 }
 0x983   :  { %847 = vmatpush1.msra.mxu1 %v1452_v34 }
 0x984   :  { %848 = vmatprep.subr.mxu1 %v1459_v35 }
 0x985   :  { %849 = vmatpush1.msra.mxu1 %v1466_v36 }
 0x986   :  { %850 = vmatprep.subr.mxu1 %v1473_v37 }
 0x987   :  { %851 = vmatpush1.msra.mxu1 %v1480_v38 }
 0x988   :  { %852 = vmatprep.subr.mxu1 %v1487_v39 }
 0x989   :  { %853 = vmatpush1.msra.mxu1 %v1494_v40 }
 0x98a   :  { %854 = vmatprep.subr.mxu1 %v1501_v41 }
 0x98b   :  { %855 = vmatpush1.msra.mxu1 %v1508_v42 }
 0x98c   :  { %856 = vmatprep.subr.mxu1 %v1523_v46 }
 0x98d   :  { %857 = vmatpush1.msra.mxu1 %v1529_v47 }
 0x98e   :  { %858 = vmatprep.subr.mxu1 %v1536_v48 }
 0x98f   :  { %859 = vmatpush1.msra.mxu1 %v1543_v49 }
 0x990   :  { %1056 = vmatprep.subr.mxu1 %v1436_v31 }
 0xa40   :  { %v682_v1 = vpop.f32.mrf.mxu1 }
 0xa41   :  { %v687_v6 = vadd.f32 %v682_v1, %v216_v20 }
 0xa42   :  { %v684_v2 = vpop.f32.mrf.mxu1 }
 0xa43   :  { %v688_v3 = vadd.f32 %v684_v2, %v218_v21  ;;  %v1205_v7 = vmul.f32 -1.442695, %v687_v6 }
 0xa45   :  { %1275 = vtanh.f32 %v688_v3  ;;  %v1206_v16 = vmul.f32 -1.442695, %v688_v3 }
 0xa46   :  { %1277 = vpow2.f32 %v1205_v7 }
 0xa52   :  { %v1276_v5 = vpop.eup %1275 }
 0xa53   :  { %704 = vrot.lane.b32.xlu1 %v1276_v5, %s1341_s1  ;;  %v1278_v8 = vpop.eup %1277 }
 0xa54   :  { %v695_v9 = vadd.f32 1.0, %v1278_v8 }
 0xa56   :  { %1279 = vrcp.f32 %v695_v9 }
 0xa63   :  { %v1280_v10 = vpop.eup %1279 }
 0xa64   :  { %v702_v13 = vmul.f32 %v1280_v10, %v606_v57 }
 0xac5   :  { %v705_v11 = vpop.permute.xlu1 %704 }
 0xac6   :  { %v707_v12 = vmul.f32 %v1280_v10, %v705_v11 }
 0xac8   :  { %709 = vrot.lane.b32.xlu0 %v707_v12, %s1341_s1 }
 0xb3a   :  { %v710_v31 = vpop.permute.xlu0 %709 }
 0xb3b   :  { %v712_v14 = vadd.f32 %v710_v31, %v702_v13 }
 0xb3d   :  { %1281 = vtanh.f32 %v712_v14 }
 0xb3e   :  { %1283 = vpow2.f32 %v1206_v16 }
 0xb4a   :  { %v1282_v15 = vpop.eup %1281 }
 0xb4b   :  { %715 = vrot.lane.b32.xlu1 %v1282_v15, %s1341_s1  ;;  %v1284_v17 = vpop.eup %1283 }
 0xb4c   :  { %v696_v18 = vadd.f32 1.0, %v1284_v17 }
 0xb4e   :  { %1285 = vrcp.f32 %v696_v18 }
 0xb5b   :  { %v1286_v19 = vpop.eup %1285 }
 0xbbd   :  { %v716_v20 = vpop.permute.xlu1 %715 }
 0xbbe   :  { %v718_v21 = vmul.f32 %v1286_v19, %v716_v20 }
 0xbc0   :  { %1207 = vmatmul.mubr.msk.f32.vlgmr.msra.gmra.mxu0 %vm294_vm5, %v718_v21 }
 0xbc1   :  { %951 = vmatpush1.msra.mxu0 %v1441_v32  ;;  %998 = vmatprep.mubr.f32.mxu0 %v1340_v4 }
 0xbc2   :  { %952 = vmatprep.subr.mxu0 %v1446_v33 }
 0xbc3   :  { %953 = vmatpush1.msra.mxu0 %v1452_v34 }
 0xbc4   :  { %954 = vmatprep.subr.mxu0 %v1459_v35 }
 0xbc5   :  { %955 = vmatpush1.msra.mxu0 %v1466_v36 }
 0xbc6   :  { %956 = vmatprep.subr.mxu0 %v1473_v37 }
 0xbc7   :  { %957 = vmatpush1.msra.mxu0 %v1480_v38 }
 0xbc8   :  { %958 = vmatprep.subr.mxu0 %v1487_v39 }
 0xbc9   :  { %959 = vmatpush1.msra.mxu0 %v1494_v40 }
 0xbca   :  { %960 = vmatprep.subr.mxu0 %v1501_v41 }
 0xbcb   :  { %961 = vmatpush1.msra.mxu0 %v1508_v42 }
 0xbcc   :  { %962 = vmatprep.subr.mxu0 %v1523_v46 }
 0xbcd   :  { %963 = vmatpush1.msra.mxu0 %v1529_v47 }
 0xbce   :  { %964 = vmatprep.subr.mxu0 %v1536_v48 }
 0xbcf   :  { %965 = vmatpush1.msra.mxu0 %v1543_v49 }
 0xc80   :  { %v788_v28 = vpop.f32.mrf.mxu0 }
 0xc81   :  { %v793_v44 = vadd.f32 %v788_v28, %v1669_v22 }
 0xc82   :  { %v790_v29 = vpop.f32.mrf.mxu0 }
 0xc83   :  { %v794_v30 = vadd.f32 %v790_v29, %v1671_v23  ;;  %v1208_v45 = vmul.f32 -1.442695, %v793_v44 }
 0xc85   :  { %1287 = vtanh.f32 %v794_v30  ;;  %v1209_v58 = vmul.f32 -1.442695, %v794_v30 }
 0xc86   :  { %1289 = vpow2.f32 %v1208_v45 }
 0xc92   :  { %v1288_v43 = vpop.eup %1287 }
 0xc93   :  { %810 = vrot.lane.b32.xlu0 %v1288_v43, %s1341_s1  ;;  %v1290_v50 = vpop.eup %1289 }
 0xc94   :  { %v801_v51 = vadd.f32 1.0, %v1290_v50 }
 0xc96   :  { %1291 = vrcp.f32 %v801_v51 }
 0xca3   :  { %v1292_v52 = vpop.eup %1291 }
 0xca4   :  { %v808_v55 = vmul.f32 %v1292_v52, %v712_v14 }
 0xd05   :  { %v811_v53 = vpop.permute.xlu0 %810 }
 0xd06   :  { %v813_v54 = vmul.f32 %v1292_v52, %v811_v53 }
 0xd08   :  { %815 = vrot.lane.b32.xlu1 %v813_v54, %s1341_s1 }
 0xd7a   :  { %v816_v56 = vpop.permute.xlu1 %815 }
 0xd7b   :  { %v818_v57 = vadd.f32 %v816_v56, %v808_v55 }
 0xd7d   :  { %1293 = vtanh.f32 %v818_v57 }
 0xd7e   :  { %1295 = vpow2.f32 %v1209_v58 }
 0xd8a   :  { %v1294_v23 = vpop.eup %1293 }
 0xd8b   :  { %821 = vrot.lane.b32.xlu0 %v1294_v23, %s1341_s1  ;;  %v1296_v22 = vpop.eup %1295 }
 0xd8c   :  { %v802_v59 = vadd.f32 1.0, %v1296_v22 }
 0xd8e   :  { %1297 = vrcp.f32 %v802_v59 }
 0xd9b   :  { %v1298_v60 = vpop.eup %1297 }
 0xdfd   :  { %v822_v61 = vpop.permute.xlu0 %821 }
 0xdfe   :  { %v824_v62 = vmul.f32 %v1298_v60, %v822_v61 }
 0xe00   :  { %1210 = vmatmul.mubr.msk.f32.vlgmr.msra.gmra.mxu1 %vm294_vm5, %v824_v62  ;;  %v1219_v62 = vld [vmem:[%s1776_s3] ss:$0 sm:$0xff] }
 0xe01   :  { %1057 = vmatpush1.msra.mxu1 %v1441_v32  ;;  %1104 = vmatprep.mubr.f32.mxu1 %v1340_v4 }
 0xe02   :  { %1058 = vmatprep.subr.mxu1 %v1446_v33 }
 0xe03   :  { %1059 = vmatpush1.msra.mxu1 %v1452_v34 }
 0xe04   :  { %1060 = vmatprep.subr.mxu1 %v1459_v35 }
 0xe05   :  { %1061 = vmatpush1.msra.mxu1 %v1466_v36 }
 0xe06   :  { %1062 = vmatprep.subr.mxu1 %v1473_v37 }
 0xe07   :  { %1063 = vmatpush1.msra.mxu1 %v1480_v38 }
 0xe08   :  { %1064 = vmatprep.subr.mxu1 %v1487_v39 }
 0xe09   :  { %1065 = vmatpush1.msra.mxu1 %v1494_v40 }
 0xe0a   :  { %1066 = vmatprep.subr.mxu1 %v1501_v41 }
 0xe0b   :  { %1067 = vmatpush1.msra.mxu1 %v1508_v42 }
 0xe0c   :  { %1068 = vmatprep.subr.mxu1 %v1523_v46 }
 0xe0d   :  { %1069 = vmatpush1.msra.mxu1 %v1529_v47 }
 0xe0e   :  { %1070 = vmatprep.subr.mxu1 %v1536_v48 }
 0xe0f   :  { %1071 = vmatpush1.msra.mxu1 %v1543_v49 }
 0xec0   :  { %v894_v4 = vpop.f32.mrf.mxu1 }
 0xec1   :  { %v899_v35 = vadd.f32 %v894_v4, %v1673_v24 }
 0xec2   :  { %v896_v32 = vpop.f32.mrf.mxu1 }
 0xec3   :  { %v900_v33 = vadd.f32 %v896_v32, %v1675_v25  ;;  %v1211_v36 = vmul.f32 -1.442695, %v899_v35 }
 0xec5   :  { %1299 = vtanh.f32 %v900_v33  ;;  %v1212_v49 = vmul.f32 -1.442695, %v900_v33 }
 0xec6   :  { %1301 = vpow2.f32 %v1211_v36 }
 0xed2   :  { %v1300_v34 = vpop.eup %1299 }
 0xed3   :  { %916 = vrot.lane.b32.xlu1 %v1300_v34, %s1341_s1  ;;  %v1302_v37 = vpop.eup %1301 }
 0xed4   :  { %v907_v38 = vadd.f32 1.0, %v1302_v37 }
 0xed6   :  { %1303 = vrcp.f32 %v907_v38 }
 0xee3   :  { %v1304_v39 = vpop.eup %1303 }
 0xee4   :  { %v914_v42 = vmul.f32 %v1304_v39, %v818_v57 }
 0xf45   :  { %v917_v40 = vpop.permute.xlu1 %916 }
 0xf46   :  { %v919_v41 = vmul.f32 %v1304_v39, %v917_v40 }
 0xf48   :  { %921 = vrot.lane.b32.xlu0 %v919_v41, %s1341_s1 }
 0xfba   :  { %v922_v46 = vpop.permute.xlu0 %921 }
 0xfbb   :  { %v924_v47 = vadd.f32 %v922_v46, %v914_v42 }
 0xfbd   :  { %1305 = vtanh.f32 %v924_v47 }
 0xfbe   :  { %1307 = vpow2.f32 %v1212_v49 }
 0xfca   :  { %v1306_v48 = vpop.eup %1305 }
 0xfcb   :  { %927 = vrot.lane.b32.xlu1 %v1306_v48, %s1341_s1  ;;  %v1308_v24 = vpop.eup %1307 }
 0xfcc   :  { %v908_v25 = vadd.f32 1.0, %v1308_v24 }
 0xfce   :  { %1309 = vrcp.f32 %v908_v25 }
 0xfdb   :  { %v1310_v63 = vpop.eup %1309 }
0x103d   :  { %v928_v0 = vpop.permute.xlu1 %927 }
0x103e   :  { %v930_v1 = vmul.f32 %v1310_v63, %v928_v0 }
0x1040   :  { %1213 = vmatmul.mubr.msk.f32.vlgmr.msra.gmra.mxu0 %vm294_vm5, %v930_v1 }
0x1100   :  { %v1000_v2 = vpop.f32.mrf.mxu0 }
0x1101   :  { %v1005_v7 = vadd.f32 %v1000_v2, %v1677_v26 }
0x1102   :  { %v1002_v3 = vpop.f32.mrf.mxu0 }
0x1103   :  { %v1006_v5 = vadd.f32 %v1002_v3, %v1679_v27  ;;  %v1214_v8 = vmul.f32 -1.442695, %v1005_v7 }
0x1105   :  { %1311 = vtanh.f32 %v1006_v5  ;;  %v1215_v17 = vmul.f32 -1.442695, %v1006_v5 }
0x1106   :  { %1313 = vpow2.f32 %v1214_v8 }
0x1112   :  { %v1312_v6 = vpop.eup %1311 }
0x1113   :  { %1022 = vrot.lane.b32.xlu0 %v1312_v6, %s1341_s1  ;;  %v1314_v9 = vpop.eup %1313 }
0x1114   :  { %v1013_v10 = vadd.f32 1.0, %v1314_v9 }
0x1116   :  { %1315 = vrcp.f32 %v1013_v10 }
0x1123   :  { %v1316_v11 = vpop.eup %1315 }
0x1124   :  { %v1020_v31 = vmul.f32 %v1316_v11, %v924_v47 }
0x1185   :  { %v1023_v12 = vpop.permute.xlu0 %1022 }
0x1186   :  { %v1025_v13 = vmul.f32 %v1316_v11, %v1023_v12 }
0x1188   :  { %1027 = vrot.lane.b32.xlu1 %v1025_v13, %s1341_s1 }
0x11fa   :  { %v1028_v14 = vpop.permute.xlu1 %1027 }
0x11fb   :  { %v1030_v15 = vadd.f32 %v1028_v14, %v1020_v31 }
0x11fd   :  { %1317 = vtanh.f32 %v1030_v15 }
0x11fe   :  { %1319 = vpow2.f32 %v1215_v17 }
0x120a   :  { %v1318_v16 = vpop.eup %1317 }
0x120b   :  { %1033 = vrot.lane.b32.xlu0 %v1318_v16, %s1341_s1  ;;  %v1320_v18 = vpop.eup %1319 }
0x120c   :  { %v1014_v19 = vadd.f32 1.0, %v1320_v18 }
0x120e   :  { %1321 = vrcp.f32 %v1014_v19 }
0x121b   :  { %v1322_v20 = vpop.eup %1321 }
0x127d   :  { %v1034_v21 = vpop.permute.xlu0 %1033 }
0x127e   :  { %v1036_v28 = vmul.f32 %v1322_v20, %v1034_v21 }
0x1280   :  { %1216 = vmatmul.mubr.msk.f32.vlgmr.msra.gmra.mxu1 %vm294_vm5, %v1036_v28 }
0x1340   :  { %v1106_v29 = vpop.f32.mrf.mxu1 }
0x1341   :  { %v1111_v45 = vadd.f32 %v1106_v29, %v1677_v26 }
0x1342   :  { %v1108_v30 = vpop.f32.mrf.mxu1 }
0x1343   :  { %v1112_v43 = vadd.f32 %v1108_v30, %v1679_v27  ;;  %v1217_v50 = vmul.f32 -1.442695, %v1111_v45  ;;  %v10_v27 = vstv %s1775_s4 }
0x1344   :  { %11 = vst [vmem:[#allocation2] sm:$0x1] %v10_v27 }
0x1345   :  { %1323 = vtanh.f32 %v1112_v43  ;;  %v1218_v58 = vmul.f32 -1.442695, %v1112_v43 }
0x1346   :  { %1325 = vpow2.f32 %v1217_v50 }
0x134b   :  { %v1220_v34 = vld [vmem:[#allocation2] ss:$0 sm:$0xff] }
0x1352   :  { %v1324_v44 = vpop.eup %1323 }
0x1353   :  { %1128 = vrot.lane.b32.xlu1 %v1324_v44, %s1341_s1  ;;  %v1326_v51 = vpop.eup %1325 }
0x1354   :  { %v1119_v52 = vadd.f32 1.0, %v1326_v51 }
0x1356   :  { %1327 = vrcp.f32 %v1119_v52 }
0x1363   :  { %v1328_v53 = vpop.eup %1327 }
0x1364   :  { %v1126_v56 = vmul.f32 %v1328_v53, %v1030_v15 }
0x13c5   :  { %v1129_v54 = vpop.permute.xlu1 %1128 }
0x13c6   :  { %v1131_v55 = vmul.f32 %v1328_v53, %v1129_v54 }
0x13c8   :  { %1133 = vrot.lane.b32.xlu0 %v1131_v55, %s1341_s1 }
0x143a   :  { %v1134_v57 = vpop.permute.xlu0 %1133 }
0x143b   :  { %v1136_v23 = vadd.f32 %v1134_v57, %v1126_v56 }
0x143d   :  { %1329 = vtanh.f32 %v1136_v23 }
0x143e   :  { %1331 = vpow2.f32 %v1218_v58 }
0x144a   :  { %v1330_v26 = vpop.eup %1329 }
0x144b   :  { %1139 = vrot.lane.b32.xlu1 %v1330_v26, %s1341_s1  ;;  %v1332_v22 = vpop.eup %1331 }
0x144c   :  { %v1120_v59 = vadd.f32 1.0, %v1332_v22 }
0x144e   :  { %1333 = vrcp.f32 %v1120_v59 }
0x145b   :  { %v1334_v60 = vpop.eup %1333 }
0x14bd   :  { %v1140_v61 = vpop.permute.xlu1 %1139 }
0x14be   :  { %v1142_v4 = vmul.f32 %v1334_v60, %v1140_v61 }
0x14c0   :  { %v1150_v32 = vmul.f32 %v1219_v62, %v1142_v4 }
0x14c2   :  { %v1151_v33 = vsel %vm294_vm5, %v1150_v32, 0.0 }
0x14c3   :  { %1152 = vadd.xlane.f32.xlu0 %v1151_v33 }
0x154c   :  { %v1153_v35 = vpop.xlane.xlu0 %1152 }
0x154d   :  { %v1161_v36 = vadd.f32 %v1220_v34, %v1153_v35 }
0x154f   :  { %v1221_v37 = vmul.f32 -1.442695, %v1161_v36 }
0x1551   :  { %1335 = vpow2.f32 %v1221_v37 }
0x155e   :  { %v1336_v38 = vpop.eup %1335 }
0x155f   :  { %v1165_v39 = vadd.f32 1.0, %v1336_v38 }
0x1561   :  { %1337 = vrcp.f32 %v1165_v39 }
0x156e   :  { %v1338_v40 = vpop.eup %1337 }
0x156f   :  { %1169 = vst.msk [vmem:[%s1777_s5] sm:$0xff] %vm1168_vm12, %v1338_v40 }

</bundles_post_ra>
